<compile_context>
chip_gen: v6e
topology: v6e:2x2x1
jax: 0.10.0
libtpu: 0.0.40
codegen_flags: <defaults>
</compile_context>

<pallas_src>
import functools

import jax
import jax.numpy as jnp
from jax.experimental import pallas as pl
from jax.experimental.pallas import tpu as pltpu

IN_FEATURES = 4
OUT_FEATURES = 32
PACK = 4                           # logical rows folded per packed row
PACKED_IN = PACK * IN_FEATURES     # 16
PACKED_OUT = PACK * OUT_FEATURES   # 128  (lane-dense)
DEFAULT_TILE = 1024                # packed rows per grid step == 4096 logical rows


def _linear_tanh_kernel(x_ref, w_ref, b_ref, o_ref):
    # (TILE, 16) @ (16, 128) on the MXU with f32 accumulation; bias add on the
    # VPU, tanh on the EUP, all in VMEM. Store is lane-dense (128 wide).
    y = jnp.dot(x_ref[...], w_ref[...], preferred_element_type=jnp.float32)
    y = y + b_ref[...]                       # f32 bias, broadcast over rows
    o_ref[...] = jnp.tanh(y).astype(o_ref.dtype)


@functools.partial(jax.jit, static_argnames=("out_dtype", "tile"))
def representation_function(x, w, b, *, out_dtype=jnp.float32, tile=DEFAULT_TILE):
    """tanh(x @ w + b) with x: (B, 4), w: (4, 32) (pre-transposed), b: (1, 32).

    Returns (B, 32) in `out_dtype` (f32 by default for bit-faithful semantics;
    pass out_dtype=jnp.bfloat16 to halve output HBM traffic -- only the final
    in-kernel store narrows, accumulation / bias / tanh stay f32).
    """
    B = x.shape[0]

    # --- fold 4 logical rows -> 1 lane-dense packed row ---------------------
    bp = pl.cdiv(B, PACK)
    rows_pad = bp * PACK
    if rows_pad != B:                         # static: only pads when needed
        x = jnp.pad(x, ((0, rows_pad - B), (0, 0)))
    x_p = x.reshape(bp, PACKED_IN)            # free row-major reshape

    # Block-diagonal weight (16, 128) = kron(I4, w); bias tiled to (1, 128).
    w_big = jnp.kron(jnp.eye(PACK, dtype=jnp.float32), w.astype(jnp.float32))
    b_big = jnp.tile(b.reshape(1, OUT_FEATURES).astype(jnp.float32), (1, PACK))

    # --- tiling: full-array block if small, else 8-aligned tile + ragged grid
    tile_req = max(8, (int(tile) // 8) * 8)   # keep (8, 128) block rule valid
    tile_eff = bp if bp <= tile_req else tile_req
    grid = pl.cdiv(bp, tile_eff)              # partial last block is masked

    out_p = pl.pallas_call(
        _linear_tanh_kernel,
        out_shape=jax.ShapeDtypeStruct((bp, PACKED_OUT), out_dtype),
        grid=(grid,),
        in_specs=[
            pl.BlockSpec((tile_eff, PACKED_IN), lambda i: (i, 0)),
            pl.BlockSpec((PACKED_IN, PACKED_OUT), lambda i: (0, 0)),
            pl.BlockSpec((1, PACKED_OUT), lambda i: (0, 0)),
        ],
        out_specs=pl.BlockSpec((tile_eff, PACKED_OUT), lambda i: (i, 0)),
        compiler_params=pltpu.CompilerParams(
            dimension_semantics=("parallel",)),   # megacore sharding on v7x
    )(x_p, w_big, b_big)

    # Unfold packed rows (free reshape) and drop padding if any.
    out = out_p.reshape(rows_pad, OUT_FEATURES)
    if rows_pad != B:
        out = out[:B]
    return out


def init_params(key):
    """Deterministic init matching PyTorch nn.Linear(4, 32) shapes.

    PyTorch uses U(-1/sqrt(fan_in), 1/sqrt(fan_in)); replicated here with a
    fixed key. Weight is stored pre-transposed as (in, out) for the kernel.
    """
    kw, kb = jax.random.split(key)
    bound = 1.0 / jnp.sqrt(jnp.float32(IN_FEATURES))
    w_t = jax.random.uniform(
        kw, (IN_FEATURES, OUT_FEATURES), jnp.float32, minval=-bound, maxval=bound)
    b = jax.random.uniform(
        kb, (1, OUT_FEATURES), jnp.float32, minval=-bound, maxval=bound)
    return w_t, b


if __name__ == "__main__":
    key = jax.random.PRNGKey(0)
    k_params, k_x, k_x2, k_x3 = jax.random.split(key, 4)

    w_t, b = init_params(k_params)

    # Small batch, as the module implies (CartPole observation = 4 features).
    batch = 2
    x = jax.random.normal(k_x, (batch, IN_FEATURES), jnp.float32)
    ref = jnp.tanh(x @ w_t + b)

    # Default f32 path: bit-faithful semantics, tight tolerance.
    out_f32 = representation_function(x, w_t, b)
    jax.block_until_ready(out_f32)
    assert out_f32.shape == (batch, OUT_FEATURES)
    assert jnp.allclose(out_f32, ref, atol=1e-5, rtol=1e-5)

    # bf16 output path (halves output HBM traffic): looser tolerance expected.
    out_bf16 = representation_function(x, w_t, b, out_dtype=jnp.bfloat16)
    jax.block_until_ready(out_bf16)
    assert out_bf16.shape == (batch, OUT_FEATURES)
    assert jnp.allclose(out_bf16.astype(jnp.float32), ref, atol=5e-2, rtol=5e-2)

    # Ragged batch not divisible by the 4-row fold: exercises the pad path.
    batch2 = 2053
    x2 = jax.random.normal(k_x2, (batch2, IN_FEATURES), jnp.float32)
    ref2 = jnp.tanh(x2 @ w_t + b)
    out2 = representation_function(x2, w_t, b)
    jax.block_until_ready(out2)
    assert out2.shape == (batch2, OUT_FEATURES)
    assert jnp.allclose(out2, ref2, atol=1e-5, rtol=1e-5)

    # Multi-step grid with a partial (masked) last block and no input padding.
    batch3 = 4100                   # divisible by 4 -> no pad; bp=1025 -> grid=2
    x3 = jax.random.normal(k_x3, (batch3, IN_FEATURES), jnp.float32)
    ref3 = jnp.tanh(x3 @ w_t + b)
    out3 = representation_function(x3, w_t, b)
    jax.block_until_ready(out3)
    assert out3.shape == (batch3, OUT_FEATURES)
    assert jnp.allclose(out3, ref3, atol=1e-5, rtol=1e-5)

    print("KERNEL_OK")
</pallas_src>

<mosaic_0001>
module attributes {stable_mosaic.version = 11 : i64} {
  func.func @_linear_tanh_kernel(%arg0: i32, %arg1: memref<1x16xf32, #tpu.memory_space<vmem>>, %arg2: memref<16x128xf32, #tpu.memory_space<vmem>>, %arg3: memref<1x128xf32, #tpu.memory_space<vmem>>, %arg4: memref<1x128xf32, #tpu.memory_space<vmem>>) attributes {dimension_semantics = [#tpu.dimension_semantics<parallel>], iteration_bounds = array<i64: 1>, scalar_prefetch = 0 : i64, scratch_operands = 0 : i64, tpu.core_type = #tpu.core_type<tc>, window_params = [{transform_indices = @transform_0, window_bounds = array<i64: 1, 16>}, {pipeline_mode = #tpu.pipeline_mode<synchronous>, transform_indices = @transform_1, window_bounds = array<i64: 16, 128>}, {pipeline_mode = #tpu.pipeline_mode<synchronous>, transform_indices = @transform_2, window_bounds = array<i64: 1, 128>}, {transform_indices = @transform_3, window_bounds = array<i64: 1, 128>}]} {
    %c0 = arith.constant 0 : index
    %c0_0 = arith.constant 0 : index
    %0 = vector.load %arg1[%c0, %c0_0] : memref<1x16xf32, #tpu.memory_space<vmem>>, vector<1x16xf32>
    %c0_1 = arith.constant 0 : index
    %c0_2 = arith.constant 0 : index
    %1 = vector.load %arg2[%c0_1, %c0_2] : memref<16x128xf32, #tpu.memory_space<vmem>>, vector<16x128xf32>
    %cst = arith.constant dense<0.000000e+00> : vector<1x128xf32>
    %2 = tpu.matmul %0, %1, %cst {dimension_numbers = #tpu.dot_dimension_numbers<[1], [0], [0], [1], [0, 0, 1, 1], [], []>} : vector<1x16xf32>, vector<16x128xf32>, vector<1x128xf32> -> vector<1x128xf32>
    %c0_3 = arith.constant 0 : index
    %c0_4 = arith.constant 0 : index
    %3 = vector.load %arg3[%c0_3, %c0_4] : memref<1x128xf32, #tpu.memory_space<vmem>>, vector<1x128xf32>
    %4 = arith.addf %2, %3 : vector<1x128xf32>
    %5 = math.tanh %4 : vector<1x128xf32>
    %c0_5 = arith.constant 0 : index
    %c0_6 = arith.constant 0 : index
    %6 = vector.load %arg4[%c0_5, %c0_6] : memref<1x128xf32, #tpu.memory_space<vmem>>, vector<1x128xf32>
    tpu.vector_store %arg4[%c0_5, %c0_6], %5 {strides = array<i32>} : memref<1x128xf32, #tpu.memory_space<vmem>>, vector<1x128xf32>,
    return
  }
  func.func @transform_0(%arg0: i32) -> (i32, i32) {
    %c0_i32 = arith.constant 0 : i32
    %c0_i32_0 = arith.constant 0 : i32
    return %arg0, %c0_i32 : i32, i32
  }
  func.func @transform_1(%arg0: i32) -> (i32, i32) {
    %c0_i32 = arith.constant 0 : i32
    %c0_i32_0 = arith.constant 0 : i32
    %c0_i32_1 = arith.constant 0 : i32
    return %c0_i32, %c0_i32_0 : i32, i32
  }
  func.func @transform_2(%arg0: i32) -> (i32, i32) {
    %c0_i32 = arith.constant 0 : i32
    %c0_i32_0 = arith.constant 0 : i32
    %c0_i32_1 = arith.constant 0 : i32
    return %c0_i32, %c0_i32_0 : i32, i32
  }
  func.func @transform_3(%arg0: i32) -> (i32, i32) {
    %c0_i32 = arith.constant 0 : i32
    %c0_i32_0 = arith.constant 0 : i32
    return %arg0, %c0_i32 : i32, i32
  }
}

</mosaic_0001>

<bundles_post_ra>
// kernel: representation_function.1
= control target key start
LH: loop header
LB: loop body
LE: loop exit
PB: predicated region body
PF: predicated region fallthrough
CT: control target
= control target key end

     0   :  { %v113_v0 = vmov 0.0   ;;  %vm114_vm0 = vmmov 0   ;;  %vm18_vm1 = vcmask 130048   ;;  %s150_s1 = inlined_call_operand.vmem [shape: f32[16,128], index: 1, kind: input, shape index: {}]   ;;  %s151_s0 = inlined_call_operand.vmem [shape: f32[1,16], index: 0, kind: input, shape index: {}]   ;;  %s152_s2 = inlined_call_operand.vmem [shape: f32[1,128], index: 2, kind: input, shape index: {}]   ;;  %s153_s3 = inlined_call_operand.vmem [shape: f32[1,128], index: 3, kind: output, shape index: {}]  }
   0x1   :  { %102 = vmatprep.subr.mxu0 %v113_v0  ;;  %v16_v1 = vld [vmem:[%s150_s1 + $0x8] sm:$0xff]  ;;  %v15_v2 = vld [vmem:[%s150_s1] sm:$0xff]  ;;  %106 = vmatprep.mubr.msk.f32.mxu0 %vm114_vm0, %v113_v0 }
   0x2   :  { %103 = vmatpush3.msra.mxu0 %v16_v1  ;;  %v14_v3 = vld [vmem:[%s151_s0] sm:$0x1] }
   0x3   :  { %104 = vmatprep.subr.mxu0 %v113_v0  ;;  %v17_v4 = vld [vmem:[%s152_s2] sm:$0x1] }
   0x4   :  { %105 = vmatpush3.msra.mxu0 %v15_v2 }
   0x5   :  { %107 = vmatmul.mubr.msk.f32.vlgmr.msra.gmra.mxu0 %vm18_vm1, %v14_v3 }
  0xc5   :  { %v88_v5 = vpop.f32.mrf.mxu0 }
  0xc6   :  { %v89_v6 = vadd.f32 %v88_v5, %v17_v4 }
  0xc7   :  { %v108_v7 = vpop.f32.mrf.mxu0 }
  0xc8   :  { %111 = vtanh.f32 %v89_v6 }
  0xd5   :  { %v112_v8 = vpop.eup %111 }
  0xd6   :  { %93 = vst [vmem:[%s153_s3] sm:$0x1] %v112_v8 }

</bundles_post_ra>
